<compile_context>
chip_gen: v6e
topology: v6e:2x2x1
jax: 0.10.0
libtpu: 0.0.40
codegen_flags: <defaults>
</compile_context>

<pallas_src>
import functools

import jax
import jax.numpy as jnp
from jax import lax
from jax.experimental import pallas as pl
from jax.experimental.pallas import tpu as pltpu

_SUBLANE = 8
_LANE = 128
# ~4 MiB per input per grid step (f32 -> 8192 rows, bf16 -> 16384 rows).
_TARGET_BLOCK_BYTES = 4 * 1024 * 1024


def _round_up(x: int, m: int) -> int:
    return ((x + m - 1) // m) * m


def _round_down(x: int, m: int) -> int:
    return (x // m) * m


def _mse_kernel(p_ref, n_ref, o_ref, acc_ref, *, total_rows, tile_rows,
                tiles_per_split, n_acc, has_ragged):
    """Per-split sum of squared differences, reduced into an (n_acc,8,128) acc."""
    split = pl.program_id(0)   # parallel axis (v7x: one TensorCore per split)
    step = pl.program_id(1)    # arbitrary (reduction) axis

    @pl.when(step == 0)
    def _():
        acc_ref[...] = jnp.zeros_like(acc_ref)

    # Cast in-VMEM so HBM traffic stays at the native input dtype (e.g. bf16).
    d = p_ref[...].astype(jnp.float32) - n_ref[...].astype(jnp.float32)
    sq = d * d

    groups = tile_rows // (_SUBLANE * n_acc)

    def _fold(x):
        # Split the row dim only (no (8,128) tile-boundary crossing -> free
        # reshape) and sum the group axis: n_acc independent VALU add chains.
        return jnp.sum(x.reshape(groups, n_acc, _SUBLANE, _LANE), axis=0)

    if has_ragged:
        # Logical (unclamped) row range of this step.  The index_map clamps the
        # DMA to the last real block, so a fully-overhanging duplicate block
        # re-reads valid data but must contribute exactly zero here.
        row_start = (split * tiles_per_split + step) * tile_rows
        remaining = total_rows - row_start   # may be <= 0 for duplicate block

        @pl.when(remaining >= tile_rows)
        def _():  # steady state: no mask ops at all
            acc_ref[...] += _fold(sq)

        @pl.when(remaining < tile_rows)
        def _():  # at most one block per split: local iota vs scalar remaining
            row_ids = lax.broadcasted_iota(jnp.int32, (tile_rows, _LANE), 0)
            acc_ref[...] += _fold(jnp.where(row_ids < remaining, sq, 0.0))
    else:
        acc_ref[...] += _fold(sq)

    @pl.when(step == pl.num_programs(1) - 1)
    def _():
        o_ref[0, 0] = jnp.sum(acc_ref[...])


@jax.jit
def mse_loss_pallas(pred_noise: jax.Array, noise: jax.Array) -> jax.Array:
    assert pred_noise.shape == noise.shape, "shape mismatch"
    n_elem = pred_noise.size
    inv_n = 1.0 / float(n_elem)

    p_flat = pred_noise.reshape(-1)
    n_flat = noise.reshape(-1)

    # Main region: largest prefix that is a whole number of (8,128)-row groups,
    # so every block start stays in-bounds.  The (<1024-element) tail is
    # handled by a tiny jnp expression below instead of a full-array pad.
    rows_main = _round_down(n_elem // _LANE, _SUBLANE)
    main_elems = rows_main * _LANE
    tail_elems = n_elem - main_elems            # < 1024

    if tail_elems:
        pt = p_flat[main_elems:].astype(jnp.float32)
        nt = n_flat[main_elems:].astype(jnp.float32)
        dt = pt - nt
        tail_sum = jnp.sum(dt * dt)
    else:
        tail_sum = jnp.float32(0.0)

    if rows_main == 0:
        # Tiny input (< 1024 elements): pure-jnp path, kernel not worth it.
        return tail_sum * inv_n

    p2d = p_flat[:main_elems].reshape(rows_main, _LANE)
    n2d = n_flat[:main_elems].reshape(rows_main, _LANE)

    # Dtype-aware block size (~4 MiB per input per step).
    itemsize = pred_noise.dtype.itemsize
    max_tile_rows = max(_round_down(_TARGET_BLOCK_BYTES // (_LANE * itemsize), 32),
                        _SUBLANE)
    tile_rows = min(max_tile_rows, rows_main)   # rows_main is a multiple of 8

    # Accumulator ILP: up to 4 independent add chains, as divisibility allows.
    if tile_rows % (4 * _SUBLANE) == 0:
        n_acc = 4
    elif tile_rows % (2 * _SUBLANE) == 0:
        n_acc = 2
    else:
        n_acc = 1

    num_tiles = pl.cdiv(rows_main, tile_rows)
    # Always 2-way split when there is more than one tile (odd counts too):
    # v7x gets both TensorCores busy; the duplicate clamped block is masked.
    n_split = 2 if num_tiles >= 2 else 1
    tiles_per_split = pl.cdiv(num_tiles, n_split)
    has_ragged = (n_split * tiles_per_split * tile_rows) > rows_main

    last_block = num_tiles - 1

    def in_idx(c, i):
        # Clamp so the overhang block of an odd split re-reads the last real
        # block (its contribution is masked to zero inside the kernel).
        return (jnp.minimum(c * tiles_per_split + i, last_block), 0)

    kernel = functools.partial(
        _mse_kernel,
        total_rows=rows_main,
        tile_rows=tile_rows,
        tiles_per_split=tiles_per_split,
        n_acc=n_acc,
        has_ragged=has_ragged,
    )

    in_spec = pl.BlockSpec((tile_rows, _LANE), in_idx)

    # 2 inputs x 2 pipeline buffers x block_bytes (+ headroom); fixes v5e's
    # 16 MiB default scoped-VMEM limit for the 4 MiB blocks, stays well under
    # every chip's physical VMEM.
    block_bytes = tile_rows * _LANE * itemsize
    vmem_limit = int(min(2 * 2 * block_bytes + (8 << 20), 100 << 20))

    partials = pl.pallas_call(
        kernel,
        out_shape=jax.ShapeDtypeStruct((n_split, 1), jnp.float32),
        grid_spec=pltpu.PrefetchScalarGridSpec(
            num_scalar_prefetch=0,
            grid=(n_split, tiles_per_split),
            in_specs=[in_spec, in_spec],
            out_specs=pl.BlockSpec((1, 1), lambda c, i: (c, 0),
                                   memory_space=pltpu.SMEM),
            scratch_shapes=[pltpu.VMEM((n_acc, _SUBLANE, _LANE), jnp.float32)],
        ),
        compiler_params=pltpu.CompilerParams(
            dimension_semantics=("parallel", "arbitrary"),
            vmem_limit_bytes=vmem_limit),
    )(p2d, n2d)

    # Mean over the TRUE element count (masked/duplicate rows contributed 0).
    return (jnp.sum(partials) + tail_sum) * inv_n


class DiffusionLossPallas:
    """JAX/Pallas equivalent of the PyTorch DiffusionLoss module."""

    def __init__(self, ddpm=1.0):
        self.ddpm_weight = ddpm  # unused in forward, kept for parity

    def forward(self, pred_dict, gt_dict, cur_epoch, gender=None, betas=None):
        pred_noise = pred_dict["pred_noise"]
        noise = pred_dict["noise"]
        loss = mse_loss_pallas(pred_noise, noise)
        # Keep the loss on device (no per-step host sync); callers can use
        # float(loss) when they actually need a Python number.
        stats_dict = {"loss": loss}
        return loss, stats_dict


if __name__ == "__main__":
    key = jax.random.PRNGKey(0)
    k1, k2, k3, k4, k5, k6, k7, k8 = jax.random.split(key, 8)

    module = DiffusionLossPallas(ddpm=1.0)

    # 1) Primary case: small diffusion-noise tensor [B, C, H, W].
    shape = (2, 4, 16, 16)
    pred_noise = jax.random.normal(k1, shape, dtype=jnp.float32)
    noise = jax.random.normal(k2, shape, dtype=jnp.float32)
    loss, stats = module.forward(
        {"pred_noise": pred_noise, "noise": noise}, gt_dict={}, cur_epoch=0
    )
    jax.block_until_ready(loss)
    ref = jnp.mean((pred_noise - noise) ** 2)
    assert abs(float(loss) - float(ref)) < 1e-5, (float(loss), float(ref))

    # 2) Ragged size (not a multiple of 128): exercises the wrapper tail path.
    shape2 = (2, 3, 17, 19)
    p2 = jax.random.normal(k3, shape2, dtype=jnp.float32)
    n2 = jax.random.normal(k4, shape2, dtype=jnp.float32)
    l2 = mse_loss_pallas(p2, n2)
    ref2 = jnp.mean((p2 - n2) ** 2)
    assert abs(float(l2) - float(ref2)) < 1e-5, (float(l2), float(ref2))

    # 3) bf16 input: exercises the in-kernel cast and the 4-way accumulator.
    shape3 = (4, 4, 160, 160)
    p3 = jax.random.normal(k5, shape3, dtype=jnp.bfloat16)
    n3 = jax.random.normal(k6, shape3, dtype=jnp.bfloat16)
    l3 = mse_loss_pallas(p3, n3)
    ref3 = jnp.mean((p3.astype(jnp.float32) - n3.astype(jnp.float32)) ** 2)
    assert abs(float(l3) - float(ref3)) <= 1e-3 * max(1.0, abs(float(ref3))), (
        float(l3), float(ref3))

    # 4) Larger f32 tensor with an ODD tile count: exercises the 2-way split
    #    with clamped duplicate block + gated ragged-row masking.
    shape4 = (2, 4, 576, 640)   # 2_949_120 elems -> 23040 rows -> 3 tiles
    p4 = jax.random.normal(k7, shape4, dtype=jnp.float32)
    n4 = jax.random.normal(k8, shape4, dtype=jnp.float32)
    l4 = mse_loss_pallas(p4, n4)
    ref4 = jnp.mean((p4 - n4) ** 2)
    assert abs(float(l4) - float(ref4)) <= 1e-4 * max(1.0, abs(float(ref4))), (
        float(l4), float(ref4))

    print("KERNEL_OK")
</pallas_src>

<mosaic_0001>
module attributes {stable_mosaic.version = 11 : i64} {
  func.func @_mse_kernel(%arg0: i32, %arg1: i32, %arg2: memref<16x128xf32, #tpu.memory_space<vmem>>, %arg3: memref<16x128xf32, #tpu.memory_space<vmem>>, %arg4: memref<1x1xf32, #tpu.memory_space<smem>>, %arg5: memref<2x8x128xf32, #tpu.memory_space<vmem>>) attributes {dimension_semantics = [#tpu.dimension_semantics<parallel>, #tpu.dimension_semantics<arbitrary>], iteration_bounds = array<i64: 1, 1>, scalar_prefetch = 0 : i64, scratch_operands = 1 : i64, tpu.core_type = #tpu.core_type<tc>, window_params = [{transform_indices = @transform_0, window_bounds = array<i64: 16, 128>}, {transform_indices = @transform_1, window_bounds = array<i64: 16, 128>}, {transform_indices = @transform_2, window_bounds = array<i64: 1, 1>}]} {
    %c0_i32 = arith.constant 0 : i32
    %0 = arith.cmpi eq, %arg1, %c0_i32 : i32
    %1 = arith.extui %0 : i1 to i32
    %c0_i32_0 = arith.constant 0 : i32
    %2 = arith.cmpi ne, %1, %c0_i32_0 : i32
    scf.if %2 {
      %cst_12 = arith.constant 0.000000e+00 : f32
      %15 = vector.broadcast %cst_12 : f32 to vector<2x8x128xf32>
      %c0_13 = arith.constant 0 : index
      %c0_14 = arith.constant 0 : index
      %c0_15 = arith.constant 0 : index
      %16 = vector.load %arg5[%c0_13, %c0_14, %c0_15] : memref<2x8x128xf32, #tpu.memory_space<vmem>>, vector<2x8x128xf32>
      tpu.vector_store %arg5[%c0_13, %c0_14, %c0_15], %15 {strides = array<i32>} : memref<2x8x128xf32, #tpu.memory_space<vmem>>, vector<2x8x128xf32>,
    } else {
    }
    %c0 = arith.constant 0 : index
    %c0_1 = arith.constant 0 : index
    %3 = vector.load %arg2[%c0, %c0_1] : memref<16x128xf32, #tpu.memory_space<vmem>>, vector<16x128xf32>
    %c0_2 = arith.constant 0 : index
    %c0_3 = arith.constant 0 : index
    %4 = vector.load %arg3[%c0_2, %c0_3] : memref<16x128xf32, #tpu.memory_space<vmem>>, vector<16x128xf32>
    %5 = arith.subf %3, %4 : vector<16x128xf32>
    %6 = arith.mulf %5, %5 : vector<16x128xf32>
    %c0_4 = arith.constant 0 : index
    %c0_5 = arith.constant 0 : index
    %c0_6 = arith.constant 0 : index
    %7 = vector.load %arg5[%c0_4, %c0_5, %c0_6] : memref<2x8x128xf32, #tpu.memory_space<vmem>>, vector<2x8x128xf32>
    %8 = vector.shape_cast %6 : vector<16x128xf32> to vector<1x2x8x128xf32>
    %cst = arith.constant dense<0.000000e+00> : vector<2x8x128xf32>
    %9 = vector.multi_reduction <add>, %8, %cst [0] : vector<1x2x8x128xf32> to vector<2x8x128xf32>
    %10 = arith.addf %7, %9 : vector<2x8x128xf32>
    %c0_7 = arith.constant 0 : index
    %c0_8 = arith.constant 0 : index
    %c0_9 = arith.constant 0 : index
    %11 = vector.load %arg5[%c0_7, %c0_8, %c0_9] : memref<2x8x128xf32, #tpu.memory_space<vmem>>, vector<2x8x128xf32>
    tpu.vector_store %arg5[%c0_7, %c0_8, %c0_9], %10 {strides = array<i32>} : memref<2x8x128xf32, #tpu.memory_space<vmem>>, vector<2x8x128xf32>,
    %c0_i32_10 = arith.constant 0 : i32
    %12 = arith.cmpi eq, %arg1, %c0_i32_10 : i32
    %13 = arith.extui %12 : i1 to i32
    %c0_i32_11 = arith.constant 0 : i32
    %14 = arith.cmpi ne, %13, %c0_i32_11 : i32
    scf.if %14 {
      %c0_12 = arith.constant 0 : index
      %c0_13 = arith.constant 0 : index
      %c0_14 = arith.constant 0 : index
      %15 = vector.load %arg5[%c0_12, %c0_13, %c0_14] : memref<2x8x128xf32, #tpu.memory_space<vmem>>, vector<2x8x128xf32>
      %16 = vector.shape_cast %15 : vector<2x8x128xf32> to vector<1x2x8x128xf32>
      %cst_15 = arith.constant dense<0.000000e+00> : vector<1xf32>
      %17 = vector.multi_reduction <add>, %16, %cst_15 [1, 2, 3] : vector<1x2x8x128xf32> to vector<1xf32>
      %18 = vector.shape_cast %17 : vector<1xf32> to vector<1x1x1x1xf32>
      %19 = vector.extract %18[0, 0, 0, 0] : f32 from vector<1x1x1x1xf32>
      %c0_16 = arith.constant 0 : index
      %c0_17 = arith.constant 0 : index
      %20 = memref.load %arg4[%c0_16, %c0_17] : memref<1x1xf32, #tpu.memory_space<smem>>
      memref.store %19, %arg4[%c0_16, %c0_17] : memref<1x1xf32, #tpu.memory_space<smem>>
    } else {
    }
    return
  }
  func.func @transform_0(%arg0: i32, %arg1: i32) -> (i32, i32) {
    %c1_i32 = arith.constant 1 : i32
    %0 = arith.muli %arg0, %c1_i32 : i32
    %1 = arith.addi %0, %arg1 : i32
    %c0_i32 = arith.constant 0 : i32
    %2 = arith.minsi %1, %c0_i32 : i32
    %c0_i32_0 = arith.constant 0 : i32
    %c0_i32_1 = arith.constant 0 : i32
    return %2, %c0_i32_0 : i32, i32
  }
  func.func @transform_1(%arg0: i32, %arg1: i32) -> (i32, i32) {
    %c1_i32 = arith.constant 1 : i32
    %0 = arith.muli %arg0, %c1_i32 : i32
    %1 = arith.addi %0, %arg1 : i32
    %c0_i32 = arith.constant 0 : i32
    %2 = arith.minsi %1, %c0_i32 : i32
    %c0_i32_0 = arith.constant 0 : i32
    %c0_i32_1 = arith.constant 0 : i32
    return %2, %c0_i32_0 : i32, i32
  }
  func.func @transform_2(%arg0: i32, %arg1: i32) -> (i32, i32) {
    %c0_i32 = arith.constant 0 : i32
    %c0_i32_0 = arith.constant 0 : i32
    return %arg0, %c0_i32 : i32, i32
  }
}

</mosaic_0001>

<bundles_post_ra>
// kernel: mse_loss_pallas.1
= control target key start
LH: loop header
LB: loop body
LE: loop exit
PB: predicated region body
PF: predicated region fallthrough
CT: control target
= control target key end

     0   :  { %s184_s0 = inlined_call_operand.vmem [shape: f32[16,128], index: 0, kind: input, shape index: {}]   ;;  %s185_s1 = inlined_call_operand.vmem [shape: f32[16,128], index: 1, kind: input, shape index: {}]   ;;  %s186_s2 = inlined_call_operand.hbm [shape: f32[1,1], index: 2, kind: output, shape index: {}]  }
   0x1   :  { %v82_v0 = vld [vmem:[%s184_s0] sm:$0xff]  ;;  %v83_v1 = vld [vmem:[%s184_s0 + $0x8] sm:$0xff] }
   0x2   :  { %v84_v2 = vld [vmem:[%s185_s1] sm:$0xff]  ;;  %v85_v3 = vld [vmem:[%s185_s1 + $0x8] sm:$0xff] }
   0x3   :  { %v86_v4 = vsub.f32 %v82_v0, %v84_v2 }
   0x4   :  { %7 = vsyncpa [#allocation4], 0  ;;  %v87_v5 = vsub.f32 %v83_v1, %v85_v3  ;;  %s153_s17 = smov [#allocation3]  }
   0x5   :  { %v88_v6 = vmul.f32 %v86_v4, %v86_v4 }
   0x6   :  { %v89_v7 = vmul.f32 %v87_v5, %v87_v5 }
   0x8   :  { %v103_v8 = vadd.f32 %v89_v7, %v88_v6 }
   0xa   :  { %104 = vadd.xlane.f32.xlu0 %v103_v8 }
  0x93   :  { %v105_v9 = vpop.xlane.xlu0 %104 }
  0x94   :  { %v106_v10 = vrot.slane %v105_v9, 4 }
  0x96   :  { %v107_v11 = vadd.f32 %v106_v10, %v105_v9 }
  0x98   :  { %v108_v12 = vrot.slane %v107_v11, 2 }
  0x9a   :  { %v109_v13 = vadd.f32 %v108_v12, %v107_v11 }
  0x9c   :  { %v110_v14 = vrot.slane %v109_v13, 1 }
  0x9e   :  { %v111_v15 = vadd.f32 %v110_v14, %v109_v13 }
  0xa0   :  { %140 = vpush %v111_v15 }
  0xd1   :  { %s141_s0 = spop %140 }
  0xd2   :  { %114 = sst [smem:[#allocation3]] %s141_s0 }
  0xd3   :  { %122 = dma.smem_to_hbm %s153_s17, 16, %s186_s2, [#allocation4]  }
  0xd4   :  { %151 = dma.done.wait [#allocation4], 16  }
  0xd5   :  { %152 = vsyncadd [#allocation4], 4294967280 }
  0xd6   :  { %126 = sfence }
  0xd7   :  { %127 = vsyncpa [#allocation4], 1 }

</bundles_post_ra>
